<compile_context>
chip_gen: v6e
topology: v6e:2x2x1
jax: 0.10.0
libtpu: 0.0.40
codegen_flags: <defaults>
</compile_context>

<pallas_src>
import jax
import jax.numpy as jnp
from jax.experimental import pallas as pl
from jax.experimental.pallas import tpu as pltpu


def _mlp_kernel(x_ref, w1_ref, b1_ref, w2_ref, b2_ref, w3_ref, b3_ref, o_ref):
    # One (TB, in) batch tile per grid step; all weights/biases are full
    # resident blocks (tiny -- everything fits comfortably in VMEM).
    x = x_ref[...]
    h1 = jnp.tanh(
        jnp.dot(x, w1_ref[...], preferred_element_type=jnp.float32) + b1_ref[...]
    )
    h2 = jnp.tanh(
        jnp.dot(h1, w2_ref[...], preferred_element_type=jnp.float32) + b2_ref[...]
    )
    o = jnp.dot(h2, w3_ref[...], preferred_element_type=jnp.float32) + b3_ref[...]
    o_ref[...] = o.astype(o_ref.dtype)


def _round_up(n, m):
    return ((n + m - 1) // m) * m


def four_layer_nn(x, params, *, block_batch=4096):
    """Fused forward pass of FourLayerNN.

    x: (B, input_size) float32
    params: dict with w1 (in,h), b1 (1,h), w2 (h,h), b2 (1,h), w3 (h,out), b3 (1,out)
      (PyTorch Linear weights (out,in) are assumed already transposed to (in,out)).
    returns: (B, output_size) float32
    """
    w1, b1 = params["w1"], params["b1"]
    w2, b2 = params["w2"], params["b2"]
    w3, b3 = params["w3"], params["b3"]

    B, in_size = x.shape
    out_size = w3.shape[1]

    # Batch tile: multiple of 8 sublanes, capped at block_batch, and sized so
    # that large batches get >=2 grid steps (second TensorCore on v7x). Small
    # batches collapse to a single 8-row step.
    TB = max(8, min(_round_up(block_batch, 8), _round_up(pl.cdiv(B, 2), 8)))
    grid = (pl.cdiv(B, TB),)

    # Weights/biases: full-array blocks with a constant block index -> resident
    # in VMEM across every grid step instead of being re-streamed per tile.
    def resident(a):
        return pl.BlockSpec(a.shape, lambda i, _nd=a.ndim: (0,) * _nd)

    out = pl.pallas_call(
        _mlp_kernel,
        out_shape=jax.ShapeDtypeStruct((B, out_size), jnp.float32),
        grid=grid,
        in_specs=[
            # Full-extent last dim (in_size) is legal even though it isn't a
            # multiple of 128; only the batch axis is tiled.
            pl.BlockSpec((TB, in_size), lambda i: (i, 0)),
            resident(w1), resident(b1),
            resident(w2), resident(b2),
            resident(w3), resident(b3),
        ],
        # Full-extent last dim (out_size); edge-block rows past B are masked.
        out_specs=pl.BlockSpec((TB, out_size), lambda i: (i, 0)),
        compiler_params=pltpu.CompilerParams(
            dimension_semantics=("parallel",),  # shards batch tiles across TCs on v7x
        ),
    )(x, w1, b1, w2, b2, w3, b3)

    return out


def init_params(key, input_size, hidden_size, output_size):
    """Deterministic init mimicking PyTorch Linear default (U(-1/sqrt(fan_in), +))."""
    ks = jax.random.split(key, 6)

    def linear(kw, kb, fan_in, fan_out):
        bound = 1.0 / jnp.sqrt(jnp.float32(fan_in))
        w = jax.random.uniform(kw, (fan_in, fan_out), jnp.float32, -bound, bound)
        b = jax.random.uniform(kb, (1, fan_out), jnp.float32, -bound, bound)
        return w, b

    w1, b1 = linear(ks[0], ks[1], input_size, hidden_size)
    w2, b2 = linear(ks[2], ks[3], hidden_size, hidden_size)
    w3, b3 = linear(ks[4], ks[5], hidden_size, output_size)
    return {"w1": w1, "b1": b1, "w2": w2, "b2": b2, "w3": w3, "b3": b3}


def reference_forward(x, p):
    h1 = jnp.tanh(x @ p["w1"] + p["b1"])
    h2 = jnp.tanh(h1 @ p["w2"] + p["b2"])
    return h2 @ p["w3"] + p["b3"]


if __name__ == "__main__":
    # Iris-like sizes: 4 input features, hidden 32, 3 output classes.
    input_size, hidden_size, output_size = 4, 32, 3

    key = jax.random.PRNGKey(0)
    k_x, k_p, k_x2 = jax.random.split(key, 3)
    params = init_params(k_p, input_size, hidden_size, output_size)

    # Small Iris-scale batch: single grid step, no padding anywhere.
    batch = 8
    x = jax.random.normal(k_x, (batch, input_size), dtype=jnp.float32)
    out = jax.block_until_ready(four_layer_nn(x, params))
    ref = jax.block_until_ready(reference_forward(x, params))
    assert out.shape == (batch, output_size)
    assert jnp.allclose(out, ref, atol=1e-5, rtol=1e-5)

    # Non-multiple batch exercising the multi-tile cdiv grid + masked edge block.
    batch2 = 200
    x2 = jax.random.normal(k_x2, (batch2, input_size), dtype=jnp.float32)
    out2 = jax.block_until_ready(four_layer_nn(x2, params))
    ref2 = jax.block_until_ready(reference_forward(x2, params))
    assert out2.shape == (batch2, output_size)
    assert jnp.allclose(out2, ref2, atol=1e-5, rtol=1e-5)

    print("KERNEL_OK")
</pallas_src>

<mosaic_0001>
module attributes {stable_mosaic.version = 11 : i64} {
  func.func @_mlp_kernel(%arg0: i32, %arg1: memref<8x4xf32, #tpu.memory_space<vmem>>, %arg2: memref<4x32xf32, #tpu.memory_space<vmem>>, %arg3: memref<1x32xf32, #tpu.memory_space<vmem>>, %arg4: memref<32x32xf32, #tpu.memory_space<vmem>>, %arg5: memref<1x32xf32, #tpu.memory_space<vmem>>, %arg6: memref<32x3xf32, #tpu.memory_space<vmem>>, %arg7: memref<1x3xf32, #tpu.memory_space<vmem>>, %arg8: memref<8x3xf32, #tpu.memory_space<vmem>>) attributes {dimension_semantics = [#tpu.dimension_semantics<parallel>], iteration_bounds = array<i64: 1>, scalar_prefetch = 0 : i64, scratch_operands = 0 : i64, tpu.core_type = #tpu.core_type<tc>, window_params = [{transform_indices = @transform_0, window_bounds = array<i64: 8, 4>}, {pipeline_mode = #tpu.pipeline_mode<synchronous>, transform_indices = @transform_1, window_bounds = array<i64: 4, 32>}, {pipeline_mode = #tpu.pipeline_mode<synchronous>, transform_indices = @transform_2, window_bounds = array<i64: 1, 32>}, {pipeline_mode = #tpu.pipeline_mode<synchronous>, transform_indices = @transform_3, window_bounds = array<i64: 32, 32>}, {pipeline_mode = #tpu.pipeline_mode<synchronous>, transform_indices = @transform_4, window_bounds = array<i64: 1, 32>}, {pipeline_mode = #tpu.pipeline_mode<synchronous>, transform_indices = @transform_5, window_bounds = array<i64: 32, 3>}, {pipeline_mode = #tpu.pipeline_mode<synchronous>, transform_indices = @transform_6, window_bounds = array<i64: 1, 3>}, {transform_indices = @transform_7, window_bounds = array<i64: 8, 3>}]} {
    %c0 = arith.constant 0 : index
    %c0_0 = arith.constant 0 : index
    %0 = vector.load %arg1[%c0, %c0_0] : memref<8x4xf32, #tpu.memory_space<vmem>>, vector<8x4xf32>
    %c0_1 = arith.constant 0 : index
    %c0_2 = arith.constant 0 : index
    %1 = vector.load %arg2[%c0_1, %c0_2] : memref<4x32xf32, #tpu.memory_space<vmem>>, vector<4x32xf32>
    %cst = arith.constant dense<0.000000e+00> : vector<8x32xf32>
    %2 = tpu.matmul %0, %1, %cst {dimension_numbers = #tpu.dot_dimension_numbers<[1], [0], [0], [1], [0, 0, 1, 1], [], []>} : vector<8x4xf32>, vector<4x32xf32>, vector<8x32xf32> -> vector<8x32xf32>
    %c0_3 = arith.constant 0 : index
    %c0_4 = arith.constant 0 : index
    %3 = vector.load %arg3[%c0_3, %c0_4] : memref<1x32xf32, #tpu.memory_space<vmem>>, vector<1x32xf32>
    %4 = vector.broadcast %3 : vector<1x32xf32> to vector<8x32xf32>
    %5 = arith.addf %2, %4 : vector<8x32xf32>
    %6 = math.tanh %5 : vector<8x32xf32>
    %c0_5 = arith.constant 0 : index
    %c0_6 = arith.constant 0 : index
    %7 = vector.load %arg4[%c0_5, %c0_6] : memref<32x32xf32, #tpu.memory_space<vmem>>, vector<32x32xf32>
    %cst_7 = arith.constant dense<0.000000e+00> : vector<8x32xf32>
    %8 = tpu.matmul %6, %7, %cst_7 {dimension_numbers = #tpu.dot_dimension_numbers<[1], [0], [0], [1], [0, 0, 1, 1], [], []>} : vector<8x32xf32>, vector<32x32xf32>, vector<8x32xf32> -> vector<8x32xf32>
    %c0_8 = arith.constant 0 : index
    %c0_9 = arith.constant 0 : index
    %9 = vector.load %arg5[%c0_8, %c0_9] : memref<1x32xf32, #tpu.memory_space<vmem>>, vector<1x32xf32>
    %10 = vector.broadcast %9 : vector<1x32xf32> to vector<8x32xf32>
    %11 = arith.addf %8, %10 : vector<8x32xf32>
    %12 = math.tanh %11 : vector<8x32xf32>
    %c0_10 = arith.constant 0 : index
    %c0_11 = arith.constant 0 : index
    %13 = vector.load %arg6[%c0_10, %c0_11] : memref<32x3xf32, #tpu.memory_space<vmem>>, vector<32x3xf32>
    %cst_12 = arith.constant dense<0.000000e+00> : vector<8x3xf32>
    %14 = tpu.matmul %12, %13, %cst_12 {dimension_numbers = #tpu.dot_dimension_numbers<[1], [0], [0], [1], [0, 0, 1, 1], [], []>} : vector<8x32xf32>, vector<32x3xf32>, vector<8x3xf32> -> vector<8x3xf32>
    %c0_13 = arith.constant 0 : index
    %c0_14 = arith.constant 0 : index
    %15 = vector.load %arg7[%c0_13, %c0_14] : memref<1x3xf32, #tpu.memory_space<vmem>>, vector<1x3xf32>
    %16 = vector.broadcast %15 : vector<1x3xf32> to vector<8x3xf32>
    %17 = arith.addf %14, %16 : vector<8x3xf32>
    %c0_15 = arith.constant 0 : index
    %c0_16 = arith.constant 0 : index
    %18 = vector.load %arg8[%c0_15, %c0_16] : memref<8x3xf32, #tpu.memory_space<vmem>>, vector<8x3xf32>
    tpu.vector_store %arg8[%c0_15, %c0_16], %17 {strides = array<i32>} : memref<8x3xf32, #tpu.memory_space<vmem>>, vector<8x3xf32>,
    return
  }
  func.func @transform_0(%arg0: i32) -> (i32, i32) {
    %c0_i32 = arith.constant 0 : i32
    %c0_i32_0 = arith.constant 0 : i32
    return %arg0, %c0_i32 : i32, i32
  }
  func.func @transform_1(%arg0: i32) -> (i32, i32) {
    %c0_i32 = arith.constant 0 : i32
    %c0_i32_0 = arith.constant 0 : i32
    %c0_i32_1 = arith.constant 0 : i32
    return %c0_i32, %c0_i32_0 : i32, i32
  }
  func.func @transform_2(%arg0: i32) -> (i32, i32) {
    %c0_i32 = arith.constant 0 : i32
    %c0_i32_0 = arith.constant 0 : i32
    %c0_i32_1 = arith.constant 0 : i32
    return %c0_i32, %c0_i32_0 : i32, i32
  }
  func.func @transform_3(%arg0: i32) -> (i32, i32) {
    %c0_i32 = arith.constant 0 : i32
    %c0_i32_0 = arith.constant 0 : i32
    %c0_i32_1 = arith.constant 0 : i32
    return %c0_i32, %c0_i32_0 : i32, i32
  }
  func.func @transform_4(%arg0: i32) -> (i32, i32) {
    %c0_i32 = arith.constant 0 : i32
    %c0_i32_0 = arith.constant 0 : i32
    %c0_i32_1 = arith.constant 0 : i32
    return %c0_i32, %c0_i32_0 : i32, i32
  }
  func.func @transform_5(%arg0: i32) -> (i32, i32) {
    %c0_i32 = arith.constant 0 : i32
    %c0_i32_0 = arith.constant 0 : i32
    %c0_i32_1 = arith.constant 0 : i32
    return %c0_i32, %c0_i32_0 : i32, i32
  }
  func.func @transform_6(%arg0: i32) -> (i32, i32) {
    %c0_i32 = arith.constant 0 : i32
    %c0_i32_0 = arith.constant 0 : i32
    %c0_i32_1 = arith.constant 0 : i32
    return %c0_i32, %c0_i32_0 : i32, i32
  }
  func.func @transform_7(%arg0: i32) -> (i32, i32) {
    %c0_i32 = arith.constant 0 : i32
    %c0_i32_0 = arith.constant 0 : i32
    return %arg0, %c0_i32 : i32, i32
  }
}

</mosaic_0001>

<bundles_post_ra>
// kernel: tpu_custom_call.1
= control target key start
LH: loop header
LB: loop body
LE: loop exit
PB: predicated region body
PF: predicated region fallthrough
CT: control target
= control target key end

     0   :  { %vm39_vm0 = vcmask 1043456   ;;  %vm35_vm1 = vcmask 31744   ;;  %v342_v0 = vmov 0.0   ;;  %vm343_vm2 = vmmov 0   ;;  %s428_s1 = inlined_call_operand.vmem [shape: f32[4,32], index: 1, kind: input, shape index: {}]   ;;  %s429_s0 = inlined_call_operand.vmem [shape: f32[8,4], index: 0, kind: input, shape index: {}]   ;;  %s430_s3 = inlined_call_operand.vmem [shape: f32[32,32], index: 3, kind: input, shape index: {}]   ;;  %s431_s2 = inlined_call_operand.vmem [shape: f32[1,32], index: 2, kind: input, shape index: {}]   ;;  %s432_s5 = inlined_call_operand.vmem [shape: f32[32,3], index: 5, kind: input, shape index: {}]   ;;  %s433_s4 = inlined_call_operand.vmem [shape: f32[1,32], index: 4, kind: input, shape index: {}]   ;;  %s434_s6 = inlined_call_operand.vmem [shape: f32[1,3], index: 6, kind: input, shape index: {}]   ;;  %s435_s7 = inlined_call_operand.vmem [shape: f32[8,3], index: 7, kind: output, shape index: {}]  }
   0x1   :  { %309 = vmatprep.subr.mxu0 %v342_v0  ;;  %v27_v1 = vld [vmem:[%s428_s1] sm:$0xf]  ;;  %311 = vmatprep.mubr.msk.f32.mxu0 %vm343_vm2, %v342_v0  ;;  %v117_v3 = vld [vmem:[%s430_s3 + $0x18] sm:$0xff]  ;;  %v116_v4 = vld [vmem:[%s430_s3 + $0x10] sm:$0xff]  ;;  %vm125_vm3 = vcmask 261120   ;;  %vm284_vm4 = vcmask 23552  }
   0x2   :  { %v26_v2 = vld [vmem:[%s429_s0] sm:$0xff]  ;;  %310 = vmatpush3.msk.msra.mxu0 %vm39_vm0, %v27_v1  ;;  %314 = vmatprep.subr.mxu1 %v342_v0  ;;  %v115_v5 = vld [vmem:[%s430_s3 + $0x8] sm:$0xff]  ;;  %v203_v12 = vld [vmem:[%s432_s5 + $0x18] sm:$0xff] }
   0x3   :  { %312 = vmatmul.mubr.msk.f32.vlgmr.msra.gmra.mxu0 %vm35_vm1, %v26_v2  ;;  %322 = vmatprep.mubr.msk.f32.mxu1 %vm343_vm2, %v342_v0  ;;  %v114_v6 = vld [vmem:[%s430_s3] sm:$0xff]  ;;  %v202_v13 = vld [vmem:[%s432_s5 + $0x10] sm:$0xff]  ;;  %v201_v14 = vld [vmem:[%s432_s5 + $0x8] sm:$0xff] }
   0x4   :  { %325 = vmatprep.subr.mxu0 %v342_v0  ;;  %333 = vmatprep.mubr.msk.f32.mxu0 %vm343_vm2, %v342_v0  ;;  %v290_v7 = vld [vmem:[%s431_s2] ss:$0 sm:$0xff] }
   0x5   :  { %315 = vmatpush3.msra.mxu1 %v117_v3  ;;  %326 = vmatpush3.msra.mxu0 %v203_v12  ;;  %v200_v15 = vld [vmem:[%s432_s5] sm:$0xff] }
   0x6   :  { %316 = vmatprep.subr.mxu1 %v342_v0  ;;  %327 = vmatprep.subr.mxu0 %v342_v0  ;;  %v293_v16 = vld [vmem:[%s433_s4] ss:$0 sm:$0xff] }
   0x7   :  { %317 = vmatpush3.msra.mxu1 %v116_v4  ;;  %328 = vmatpush3.msra.mxu0 %v202_v13  ;;  %v295_v21 = vld [vmem:[%s434_s6] ss:$0 sm:$0xff] }
   0x8   :  { %318 = vmatprep.subr.mxu1 %v342_v0  ;;  %329 = vmatprep.subr.mxu0 %v342_v0 }
   0x9   :  { %319 = vmatpush3.msra.mxu1 %v115_v5  ;;  %330 = vmatpush3.msra.mxu0 %v201_v14 }
   0xa   :  { %320 = vmatprep.subr.mxu1 %v342_v0  ;;  %331 = vmatprep.subr.mxu0 %v342_v0 }
   0xb   :  { %321 = vmatpush3.msra.mxu1 %v114_v6  ;;  %332 = vmatpush3.msra.mxu0 %v200_v15 }
  0xc3   :  { %v109_v8 = vpop.f32.mrf.mxu0 }
  0xc4   :  { %v110_v9 = vadd.f32 %v290_v7, %v109_v8 }
  0xc5   :  { %v313_v10 = vpop.f32.mrf.mxu0 }
  0xc6   :  { %338 = vtanh.f32 %v110_v9 }
  0xd3   :  { %v339_v11 = vpop.eup %338 }
  0xd4   :  { %323 = vmatmul.mubr.msk.f32.vlgmr.msra.gmra.mxu1 %vm125_vm3, %v339_v11 }
 0x194   :  { %v195_v17 = vpop.f32.mrf.mxu1 }
 0x195   :  { %v196_v18 = vadd.f32 %v293_v16, %v195_v17 }
 0x196   :  { %v324_v19 = vpop.f32.mrf.mxu1 }
 0x197   :  { %340 = vtanh.f32 %v196_v18 }
 0x1a4   :  { %v341_v20 = vpop.eup %340 }
 0x1a5   :  { %334 = vmatmul.mubr.msk.f32.vlgmr.msra.gmra.mxu0 %vm125_vm3, %v341_v20 }
 0x265   :  { %v280_v22 = vpop.f32.mrf.mxu0 }
 0x266   :  { %v281_v23 = vadd.f32 %v295_v21, %v280_v22 }
 0x267   :  { %v335_v24 = vpop.f32.mrf.mxu0 }
 0x268   :  { %285 = vst.msk [vmem:[%s435_s7] sm:$0xff] %vm284_vm4, %v281_v23 }

</bundles_post_ra>
